<compile_context>
chip_gen: v5e
topology: v5e:2x2
jax: 0.10.0
libtpu: 0.0.40
codegen_flags: <defaults>
</compile_context>

<pallas_src>
import functools

import jax
import jax.numpy as jnp
from jax.experimental import pallas as pl
from jax.experimental.pallas import tpu as pltpu


# ---------------------------------------------------------------------------
# tiling helper
# ---------------------------------------------------------------------------

def _pick_tile(dim, max_tile, align):
    """Full dim if it fits, otherwise the largest multiple of `align` <= max_tile."""
    if dim <= max_tile:
        return dim
    return (max_tile // align) * align


# ---------------------------------------------------------------------------
# init kernel: single-pass per-channel sum / sum-of-squares accumulation
# ---------------------------------------------------------------------------

def _init_kernel(x_ref, loc_ref, scale_ref, *, tm, m_total, count, need_mask):
    n = pl.program_id(0)
    m = pl.program_id(1)
    is_first = jnp.logical_and(n == 0, m == 0)
    is_last = jnp.logical_and(n == pl.num_programs(0) - 1,
                              m == pl.num_programs(1) - 1)

    @pl.when(is_first)
    def _():
        loc_ref[...] = jnp.zeros_like(loc_ref)      # running sum
        scale_ref[...] = jnp.zeros_like(scale_ref)  # running sum of squares

    xb = x_ref[0].astype(jnp.float32)               # (C, TM)
    if need_mask:  # partial last M-block: zero out-of-range lanes
        col = jax.lax.broadcasted_iota(jnp.int32, xb.shape, 1) + m * tm
        xb = jnp.where(col < m_total, xb, 0.0)

    loc_ref[...] += jnp.sum(xb, axis=1, keepdims=True)
    scale_ref[...] += jnp.sum(xb * xb, axis=1, keepdims=True)

    @pl.when(is_last)
    def _():
        s = loc_ref[...]
        ss = scale_ref[...]
        mean = s / count
        # unbiased variance (torch.std default), clamped against cancellation
        var = jnp.maximum((ss - s * s / count) / (count - 1.0), 0.0)
        std = jnp.sqrt(var)
        loc_ref[...] = -mean
        # exact divide (not approx reciprocal) so logdet matches the reference
        scale_ref[...] = 1.0 / (std + 1e-6)


def _actnorm_init(x_ncm):
    """x_ncm: (N, C, M) view of the input. Returns loc (C,1), scale (C,1)."""
    N, C, M = x_ncm.shape
    tm = _pick_tile(M, 2048, 128)
    kernel = functools.partial(
        _init_kernel, tm=tm, m_total=M, count=float(N * M),
        need_mask=(M % tm != 0))
    return pl.pallas_call(
        kernel,
        out_shape=(
            jax.ShapeDtypeStruct((C, 1), jnp.float32),
            jax.ShapeDtypeStruct((C, 1), jnp.float32),
        ),
        grid=(N, pl.cdiv(M, tm)),
        in_specs=[pl.BlockSpec((1, C, tm), lambda n, m: (n, 0, m))],
        out_specs=(
            pl.BlockSpec((C, 1), lambda n, m: (0, 0)),
            pl.BlockSpec((C, 1), lambda n, m: (0, 0)),
        ),
        compiler_params=pltpu.CompilerParams(
            # both axes are part of the reduction into the resident accumulator
            dimension_semantics=("arbitrary", "arbitrary"),
            vmem_limit_bytes=32 * 1024 * 1024,
        ),
    )(x_ncm)


# ---------------------------------------------------------------------------
# apply kernel: y = scale * (x + loc), tiled over (rows, lanes), in-place
# ---------------------------------------------------------------------------

def _affine_kernel(x_ref, loc_ref, scale_ref, y_ref):
    y_ref[...] = (scale_ref[...] * (x_ref[...] + loc_ref[...])).astype(y_ref.dtype)


def _actnorm_apply(x_rm, loc_r, scale_r):
    """x_rm: (N*C, H*W); loc_r/scale_r: (N*C, 1) per-row params."""
    R, M = x_rm.shape
    tr = _pick_tile(R, 128, 8)
    tm = _pick_tile(M, 2048, 128)
    return pl.pallas_call(
        _affine_kernel,
        out_shape=jax.ShapeDtypeStruct((R, M), x_rm.dtype),
        grid=(pl.cdiv(R, tr), pl.cdiv(M, tm)),
        in_specs=[
            pl.BlockSpec((tr, tm), lambda i, j: (i, j)),
            pl.BlockSpec((tr, 1), lambda i, j: (i, 0)),
            pl.BlockSpec((tr, 1), lambda i, j: (i, 0)),
        ],
        out_specs=pl.BlockSpec((tr, tm), lambda i, j: (i, j)),
        input_output_aliases={0: 0},   # y overwrites x's buffer (elementwise, per-tile safe)
        compiler_params=pltpu.CompilerParams(
            dimension_semantics=("parallel", "parallel"),
            vmem_limit_bytes=32 * 1024 * 1024,
        ),
    )(x_rm, loc_r, scale_r)


# ---------------------------------------------------------------------------
# forward wrapper (functional: returns updated loc/scale instead of mutating)
# ---------------------------------------------------------------------------

def actnorm_forward(x_nchw, loc, scale, initialized=False, logdet=True):
    """Replicates ActNorm.forward.

    x_nchw: (N, C, H, W); loc/scale: (1, C, 1, 1).
    Returns ((y, logdet), new_loc, new_scale) if logdet else (y, new_loc, new_scale).
    """
    N, C, H, W = x_nchw.shape
    M = H * W

    if not initialized:
        loc_c, scale_c = _actnorm_init(x_nchw.reshape(N, C, M))
    else:
        loc_c = loc.reshape(C, 1).astype(jnp.float32)
        scale_c = scale.reshape(C, 1).astype(jnp.float32)

    # Per-row (row = n*C + c) params; O(N*C) bytes -- negligible.
    loc_r = jnp.broadcast_to(loc_c.reshape(1, C), (N, C)).reshape(N * C, 1)
    scale_r = jnp.broadcast_to(scale_c.reshape(1, C), (N, C)).reshape(N * C, 1)

    # NCHW -> (N*C, H*W) is a pure view reshape: no HBM transpose pre/post pass.
    y = _actnorm_apply(x_nchw.reshape(N * C, M), loc_r, scale_r).reshape(N, C, H, W)

    new_loc = loc_c.reshape(1, C, 1, 1)
    new_scale = scale_c.reshape(1, C, 1, 1)
    if logdet:
        # O(C) scalar work: kept outside the tiled hot loop.
        ld = (H * W) * jnp.sum(jnp.log(jnp.abs(scale_c)))
        return (y, ld), new_loc, new_scale
    return y, new_loc, new_scale


# ---------------------------------------------------------------------------
# pure-JAX reference (matches the PyTorch module on the first call)
# ---------------------------------------------------------------------------

def _reference_forward(x):
    N, C, H, W = x.shape
    flat = jnp.transpose(x, (1, 0, 2, 3)).reshape(C, -1)
    mean = flat.mean(axis=1)
    std = jnp.std(flat, axis=1, ddof=1)            # torch.std -> unbiased
    loc = (-mean).reshape(1, C, 1, 1)
    scale = (1.0 / (std + 1e-6)).reshape(1, C, 1, 1)
    y = scale * (x + loc)
    logdet = H * W * jnp.sum(jnp.log(jnp.abs(scale)))
    return y, logdet


if __name__ == "__main__":
    key = jax.random.PRNGKey(0)
    N, C, H, W = 2, 4, 16, 16
    x = jax.random.normal(key, (N, C, H, W), dtype=jnp.float32) * 1.7 + 0.3

    # Parameters as constructed by ActNorm.__init__ (overwritten by the
    # data-dependent init on the first forward call, since initialized == 0).
    loc0 = jnp.zeros((1, C, 1, 1), dtype=jnp.float32)
    scale0 = jnp.ones((1, C, 1, 1), dtype=jnp.float32)

    # Reference computed up front.
    y_ref, logdet_ref = _reference_forward(x)
    jax.block_until_ready((y_ref, logdet_ref))

    # First call: data-dependent init + affine + logdet.
    (y, logdet), new_loc, new_scale = actnorm_forward(
        x, loc0, scale0, initialized=False, logdet=True
    )
    jax.block_until_ready((y, logdet, new_loc, new_scale))

    assert y.shape == x.shape and y.dtype == x.dtype
    assert jnp.allclose(y, y_ref, atol=1e-4, rtol=1e-4), "output mismatch"
    assert jnp.allclose(logdet, logdet_ref, atol=1e-3, rtol=1e-4), "logdet mismatch"

    # Second call: already-initialized path reuses the learned params.
    (y2, logdet2), _, _ = actnorm_forward(
        x, new_loc, new_scale, initialized=True, logdet=True
    )
    jax.block_until_ready((y2, logdet2))
    assert jnp.allclose(y2, y_ref, atol=1e-4, rtol=1e-4), "initialized-path mismatch"

    print("KERNEL_OK")
</pallas_src>

<mosaic_0001>
module attributes {stable_mosaic.version = 11 : i64} {
  func.func @_init_kernel(%arg0: i32, %arg1: i32, %arg2: memref<1x4x256xf32, #tpu.memory_space<vmem>>, %arg3: memref<4x1xf32, #tpu.memory_space<vmem>>, %arg4: memref<4x1xf32, #tpu.memory_space<vmem>>) attributes {dimension_semantics = [#tpu.dimension_semantics<arbitrary>, #tpu.dimension_semantics<arbitrary>], iteration_bounds = array<i64: 2, 1>, scalar_prefetch = 0 : i64, scratch_operands = 0 : i64, tpu.core_type = #tpu.core_type<tc>, window_params = [{transform_indices = @transform_0, window_bounds = array<i64: 1, 4, 256>}, {pipeline_mode = #tpu.pipeline_mode<synchronous>, transform_indices = @transform_1, window_bounds = array<i64: 4, 1>}, {pipeline_mode = #tpu.pipeline_mode<synchronous>, transform_indices = @transform_2, window_bounds = array<i64: 4, 1>}]} {
    %c0_i32 = arith.constant 0 : i32
    %0 = arith.cmpi eq, %arg0, %c0_i32 : i32
    %c0_i32_0 = arith.constant 0 : i32
    %1 = arith.cmpi eq, %arg1, %c0_i32_0 : i32
    %2 = arith.andi %0, %1 : i1
    %c1_i32 = arith.constant 1 : i32
    %3 = arith.cmpi eq, %arg0, %c1_i32 : i32
    %c0_i32_1 = arith.constant 0 : i32
    %4 = arith.cmpi eq, %arg1, %c0_i32_1 : i32
    %5 = arith.andi %3, %4 : i1
    %6 = arith.extui %2 : i1 to i32
    %c0_i32_2 = arith.constant 0 : i32
    %7 = arith.cmpi ne, %6, %c0_i32_2 : i32
    scf.if %7 {
      %cst_15 = arith.constant 0.000000e+00 : f32
      %23 = vector.broadcast %cst_15 : f32 to vector<4x1xf32>
      %c0_16 = arith.constant 0 : index
      %c0_17 = arith.constant 0 : index
      %24 = vector.load %arg3[%c0_16, %c0_17] : memref<4x1xf32, #tpu.memory_space<vmem>>, vector<4x1xf32>
      tpu.vector_store %arg3[%c0_16, %c0_17], %23 {strides = array<i32>} : memref<4x1xf32, #tpu.memory_space<vmem>>, vector<4x1xf32>,
      %cst_18 = arith.constant 0.000000e+00 : f32
      %25 = vector.broadcast %cst_18 : f32 to vector<4x1xf32>
      %c0_19 = arith.constant 0 : index
      %c0_20 = arith.constant 0 : index
      %26 = vector.load %arg4[%c0_19, %c0_20] : memref<4x1xf32, #tpu.memory_space<vmem>>, vector<4x1xf32>
      tpu.vector_store %arg4[%c0_19, %c0_20], %25 {strides = array<i32>} : memref<4x1xf32, #tpu.memory_space<vmem>>, vector<4x1xf32>,
    } else {
    }
    %c0 = arith.constant 0 : index
    %c0_3 = arith.constant 0 : index
    %c0_4 = arith.constant 0 : index
    %8 = vector.load %arg2[%c0, %c0_3, %c0_4] : memref<1x4x256xf32, #tpu.memory_space<vmem>>, vector<1x4x256xf32>
    %9 = vector.shape_cast %8 : vector<1x4x256xf32> to vector<4x256xf32>
    %c0_5 = arith.constant 0 : index
    %c0_6 = arith.constant 0 : index
    %10 = vector.load %arg3[%c0_5, %c0_6] : memref<4x1xf32, #tpu.memory_space<vmem>>, vector<4x1xf32>
    %cst = arith.constant dense<0.000000e+00> : vector<4xf32>
    %11 = vector.multi_reduction <add>, %9, %cst [1] : vector<4x256xf32> to vector<4xf32>
    %12 = vector.shape_cast %11 : vector<4xf32> to vector<4x1xf32>
    %13 = arith.addf %10, %12 : vector<4x1xf32>
    %c0_7 = arith.constant 0 : index
    %c0_8 = arith.constant 0 : index
    %14 = vector.load %arg3[%c0_7, %c0_8] : memref<4x1xf32, #tpu.memory_space<vmem>>, vector<4x1xf32>
    tpu.vector_store %arg3[%c0_7, %c0_8], %13 {strides = array<i32>} : memref<4x1xf32, #tpu.memory_space<vmem>>, vector<4x1xf32>,
    %c0_9 = arith.constant 0 : index
    %c0_10 = arith.constant 0 : index
    %15 = vector.load %arg4[%c0_9, %c0_10] : memref<4x1xf32, #tpu.memory_space<vmem>>, vector<4x1xf32>
    %16 = arith.mulf %9, %9 : vector<4x256xf32>
    %cst_11 = arith.constant dense<0.000000e+00> : vector<4xf32>
    %17 = vector.multi_reduction <add>, %16, %cst_11 [1] : vector<4x256xf32> to vector<4xf32>
    %18 = vector.shape_cast %17 : vector<4xf32> to vector<4x1xf32>
    %19 = arith.addf %15, %18 : vector<4x1xf32>
    %c0_12 = arith.constant 0 : index
    %c0_13 = arith.constant 0 : index
    %20 = vector.load %arg4[%c0_12, %c0_13] : memref<4x1xf32, #tpu.memory_space<vmem>>, vector<4x1xf32>
    tpu.vector_store %arg4[%c0_12, %c0_13], %19 {strides = array<i32>} : memref<4x1xf32, #tpu.memory_space<vmem>>, vector<4x1xf32>,
    %21 = arith.extui %5 : i1 to i32
    %c0_i32_14 = arith.constant 0 : i32
    %22 = arith.cmpi ne, %21, %c0_i32_14 : i32
    scf.if %22 {
      %c0_15 = arith.constant 0 : index
      %c0_16 = arith.constant 0 : index
      %23 = vector.load %arg3[%c0_15, %c0_16] : memref<4x1xf32, #tpu.memory_space<vmem>>, vector<4x1xf32>
      %c0_17 = arith.constant 0 : index
      %c0_18 = arith.constant 0 : index
      %24 = vector.load %arg4[%c0_17, %c0_18] : memref<4x1xf32, #tpu.memory_space<vmem>>, vector<4x1xf32>
      %cst_19 = arith.constant 5.120000e+02 : f32
      %25 = vector.broadcast %cst_19 : f32 to vector<4x1xf32>
      %26 = arith.divf %23, %25 : vector<4x1xf32>
      %27 = arith.mulf %23, %23 : vector<4x1xf32>
      %cst_20 = arith.constant 5.120000e+02 : f32
      %28 = vector.broadcast %cst_20 : f32 to vector<4x1xf32>
      %29 = arith.divf %27, %28 : vector<4x1xf32>
      %30 = arith.subf %24, %29 : vector<4x1xf32>
      %cst_21 = arith.constant 5.110000e+02 : f32
      %31 = vector.broadcast %cst_21 : f32 to vector<4x1xf32>
      %32 = arith.divf %30, %31 : vector<4x1xf32>
      %cst_22 = arith.constant 0.000000e+00 : f32
      %33 = vector.broadcast %cst_22 : f32 to vector<4x1xf32>
      %34 = arith.maximumf %32, %33 : vector<4x1xf32>
      %35 = math.sqrt %34 : vector<4x1xf32>
      %cst_23 = arith.constant 0.000000e+00 : f32
      %36 = vector.broadcast %cst_23 : f32 to vector<4x1xf32>
      %37 = arith.subf %36, %26 : vector<4x1xf32>
      %c0_24 = arith.constant 0 : index
      %c0_25 = arith.constant 0 : index
      %38 = vector.load %arg3[%c0_24, %c0_25] : memref<4x1xf32, #tpu.memory_space<vmem>>, vector<4x1xf32>
      tpu.vector_store %arg3[%c0_24, %c0_25], %37 {strides = array<i32>} : memref<4x1xf32, #tpu.memory_space<vmem>>, vector<4x1xf32>,
      %cst_26 = arith.constant 9.99999997E-7 : f32
      %39 = vector.broadcast %cst_26 : f32 to vector<4x1xf32>
      %40 = arith.addf %35, %39 : vector<4x1xf32>
      %cst_27 = arith.constant 1.000000e+00 : f32
      %41 = vector.broadcast %cst_27 : f32 to vector<4x1xf32>
      %42 = arith.divf %41, %40 : vector<4x1xf32>
      %c0_28 = arith.constant 0 : index
      %c0_29 = arith.constant 0 : index
      %43 = vector.load %arg4[%c0_28, %c0_29] : memref<4x1xf32, #tpu.memory_space<vmem>>, vector<4x1xf32>
      tpu.vector_store %arg4[%c0_28, %c0_29], %42 {strides = array<i32>} : memref<4x1xf32, #tpu.memory_space<vmem>>, vector<4x1xf32>,
    } else {
    }
    return
  }
  func.func @transform_0(%arg0: i32, %arg1: i32) -> (i32, i32, i32) {
    %c0_i32 = arith.constant 0 : i32
    %c0_i32_0 = arith.constant 0 : i32
    return %arg0, %c0_i32, %arg1 : i32, i32, i32
  }
  func.func @transform_1(%arg0: i32, %arg1: i32) -> (i32, i32) {
    %c0_i32 = arith.constant 0 : i32
    %c0_i32_0 = arith.constant 0 : i32
    %c0_i32_1 = arith.constant 0 : i32
    return %c0_i32, %c0_i32_0 : i32, i32
  }
  func.func @transform_2(%arg0: i32, %arg1: i32) -> (i32, i32) {
    %c0_i32 = arith.constant 0 : i32
    %c0_i32_0 = arith.constant 0 : i32
    %c0_i32_1 = arith.constant 0 : i32
    return %c0_i32, %c0_i32_0 : i32, i32
  }
}

</mosaic_0001>

<bundles_post_ra>
// kernel: tpu_custom_call.1
= control target key start
LH: loop header
LB: loop body
LE: loop exit
PB: predicated region body
PF: predicated region fallthrough
CT: control target
= control target key end

     0   :  { %8 = vsyncpa [#allocation3], 0  ;;  %s622_s0 = inlined_call_operand.hbm [shape: f32[2,4,256], index: 0, kind: input, shape index: {}]   ;;  %s623_s1 = inlined_call_operand.vmem [shape: f32[4,1], index: 1, kind: output, shape index: {0}]   ;;  %s624_s2 = inlined_call_operand.vmem [shape: f32[4,1], index: 2, kind: output, shape index: {1}]  }
   0x1   :  { %10 = vsyncpa [#allocation3 + $0x1], 0  ;;  %s501_s9 = smov 0   ;;  %s503_s10 = smov 0  }
   0x2   :  { %s505_s11 = smov 0   ;;  %s507_s12 = smov 0  }
   0x3   :  { %s509_s13 = smov 0   ;;  %s511_s14 = smov 0  }
   0x4 LB: > { %s320_s15 = sadd.s32 4294967295, %s481_s14   ;;  %s28_s16 = sadd.s32 1, %s477_s13  ;;  %s481_s14 = sphi %s511_s14, %s16_s14   ;;  %s477_s13 = sphi %s509_s13, %s631_s13   ;;  %s473_s12 = sphi %s507_s12, %s630_s12   ;;  %s469_s11 = sphi %s505_s11, %s629_s11   ;;  %s465_s10 = sphi %s503_s10, %s628_s10   ;;  %s461_s9 = sphi %s501_s9, %s627_s9  }
   0x5   : > { %p30_p0 = scmp.ge.s32.totalorder %s28_s16, 2  ;;  %s37_s17 = sadd.s32 1, %s469_s11 }
   0x6   : > { %p44_p1 = scmp.ne.s32.totalorder %s469_s11, %s465_s10  ;;  %p45_p2 = scmp.eq.s32.totalorder %s481_s14, 0 }
   0x7   : > { %s633_s16 = smov (%p30_p0, %s28_s16), 0  ;;  %p50_p4 = scmp.ne.s32.totalorder %s465_s10, %s461_s9 }
   0x8   : > { %p537_p3 = por %p45_p2, %p44_p1  ;;  %s32_s19 = ssub.s32 %s477_s13, %s633_s16 }
   0x9   : > { %p51_p5 = scmp.eq.s32.totalorder %s320_s15, 0  ;;  %p35_p6 = scmp.eq.s32.totalorder %s32_s19, 0 }
   0xa   : > { %p341_p8 = scmp.lt.s32.totalorder %s481_s14, 2  ;;  %s116_s22 = sand.u32 1, %s469_s11  }
   0xb   : > { %p544_p7 = por %p51_p5, %p50_p4  ;;  %s332_s23 = sshll.u32 %s477_s13, 3 }
   0xc   : > { %s550_s21 = scalar_select %p35_p6, %s469_s11, %s37_s17  }
   0xd   : > { %s323_s24 = sshll.u32 %s116_s22, 3  ;;  %s127_s27 = scalar_lea.hbm %s622_s0, %s332_s23 }
   0xe   : > { %s129_s28 = sshll.u32 %s127_s27, 4  ;;  %s120_s29 = scalar_lea.vmem [#allocation2], %s323_s24  ;;  %s130_s28 = int_to_ptr.hbm [resolvable:$true] %s129_s28 }
   0xf   : > { %s131_s30 = sshll.u32 %s120_s29, 4  ;;  %p338_p9 = pnand %p341_p8, %p537_p3  ;;  %s132_s30 = int_to_ptr.vmem [resolvable:$true] %s131_s30 }
  0x10   : > { %p326_p10 = scmp.ge.s32.totalorder %s481_s14, 1  ;;  %p136_p11 = scmp.lt.s32.totalorder %s481_s14, 3 }
  0x11   : > { %s117_s3 = scalar_lea.sflag [#allocation3], %s116_s22 }
  0x12   : > { %340 = dma.hbm_to_vmem [thread:$0]  (!%p338_p9), %s130_s28, 128, %s132_s30, %s117_s3  }
  0x13   : > { %p137_p12 = pnand %p326_p10, %p136_p11 }
  0x14   : > { %s142_s4 = sand.u32 (!%p137_p12), 1, %s465_s10  }
  0x15   : > { %140 = sbr.rel (%p137_p12) target bundleno = 227 (0xe3), region = 24  ;;  %s327_s5 = sshll.u32 (!%p137_p12), %s142_s4, 3 }
  0x16   : > { %s143_s6 = scalar_lea.sflag (!%p137_p12), [#allocation3], %s142_s4  ;;  %s146_s7 = scalar_lea.vmem (!%p137_p12), [#allocation2], %s327_s5 }
  0x1a   : > { %456 = dma.done.wait (%p544_p7), %s143_s6, 128  }
  0x1b   : > { %458 = vsyncadd (%p544_p7), %s143_s6, 4294967168  ;;  %p164_p13 = scmp.eq.s32.totalorder %s473_s12, 0  ;;  %p168_p0 = scmp.eq.s32.totalorder %s473_s12, 1 }
  0x1c   : > { %vm173_vm0 = vcmask (%p164_p13), 3072   ;;  %v483_v0 = vmov (%p164_p13), 0.0  }
  0x1d   : > { %172 = sbr.rel (!%p164_p13) target bundleno = 34 (0x22), region = 32  ;;  %174 = vst.msk [vmem:[%s623_s1] sm:$0xf] (%p164_p13), %vm173_vm0, %v483_v0 }
  0x1e   : > { %175 = vst.msk [vmem:[%s624_s2] sm:$0xf] (%p164_p13), %vm173_vm0, %v483_v0 }
  0x22 PF: > { %v176_v1 = vld [vmem:[%s146_s7] sm:$0xff]  ;;  %vm184_vm1 = vcmask 1043456   ;;  %vm191_vm2 = vcmask 3072   ;;  %v484_v19 = vmov (%p168_p0), 512.0   ;;  %v485_v20 = vmov (%p168_p0), 511.0  }
  0x23   : > { %179 = vst [vmem:[#allocation1] ss:$2 sm:$0xff] %v176_v1  ;;  %v194_v2 = vmul.f32 %v176_v1, %v176_v1  ;;  %393 = vrcp.f32 (%p168_p0), %v484_v19 }
  0x24   : > { %v177_v13 = vld [vmem:[%s623_s1] sm:$0xf]  ;;  %395 = vrcp.f32 (%p168_p0), %v485_v20 }
  0x25   : > { %v193_v16 = vld [vmem:[%s624_s2] sm:$0xf] }
  0x29   : > { %v394_v21 = vpop.eup (%p168_p0), %393 }
  0x2a   : > { %v180_v3 = vld.sshfl [vmem:[#allocation1] sm:$0xff pattern:$0x75316420]  ;;  %v181_v4 = vld.sshfl [vmem:[#allocation1 + $0x8] sm:$0xff pattern:$0x75316420]  ;;  %v396_v22 = vpop.eup (%p168_p0), %395  ;;  %vm217_vm3 = vweird.f32 (%p168_p0), %v394_v21 }
  0x2b   : > { %v185_v5 = vsel %vm184_vm1, %v180_v3, 0.0  ;;  %v186_v6 = vsel %vm184_vm1, %v181_v4, 0.0  ;;  %196 = vst [vmem:[#allocation1] ss:$2 sm:$0xff] %v194_v2  ;;  %v213_v23 = vmul.f32 (%p168_p0), 512.0, %v394_v21  ;;  %v224_v24 = vmul.f32 (%p168_p0), 511.0, %v396_v22 }
  0x2c   : > { %v187_v7 = vadd.f32 %v186_v6, %v185_v5  ;;  %vm228_vm4 = vweird.f32 (%p168_p0), %v396_v22 }
  0x2d   : > { %v214_v26 = vsub.f32 (%p168_p0), 1.0, %v213_v23  ;;  %v225_v27 = vsub.f32 (%p168_p0), 1.0, %v224_v24 }
  0x2e   : > { %188 = vadd.xlane.f32.xlu0 %v187_v7 }
  0x2f   : > { %v215_v28 = vmul.f32 (%p168_p0), %v394_v21, %v214_v26  ;;  %v226_v30 = vmul.f32 (%p168_p0), %v396_v22, %v225_v27 }
  0x31   : > { %v216_v31 = vadd.f32 (%p168_p0), %v394_v21, %v215_v28  ;;  %v227_v32 = vadd.f32 (%p168_p0), %v396_v22, %v226_v30 }
  0x32   : > { %v197_v8 = vld.sshfl [vmem:[#allocation1] sm:$0xff pattern:$0x75316420]  ;;  %v198_v9 = vld.sshfl [vmem:[#allocation1 + $0x8] sm:$0xff pattern:$0x75316420] }
  0x33   : > { %v201_v10 = vsel %vm184_vm1, %v197_v8, 0.0  ;;  %v202_v11 = vsel %vm184_vm1, %v198_v9, 0.0  ;;  %v218_v33 = vsel (%p168_p0), %vm217_vm3, %v394_v21, %v216_v31  ;;  %v229_v37 = vsel (%p168_p0), %vm228_vm4, %v396_v22, %v227_v32 }
  0x34   : > { %v203_v12 = vadd.f32 %v202_v11, %v201_v10 }
  0x36   : > { %204 = vadd.xlane.f32.xlu0 %v203_v12 }
  0xa1   : > { %v189_v14 = vpop.xlane.xlu0 %188 }
  0xa2   : > { %v190_v15 = vadd.f32 %v189_v14, %v177_v13 }
  0xa4   : > { %192 = vst.msk [vmem:[%s623_s1] sm:$0xf] %vm191_vm2, %v190_v15 }
  0xa8   : > { %209 = sbr.rel (!%p168_p0) target bundleno = 227 (0xe3), region = 36 }
  0xa9   : > { %v205_v17 = vpop.xlane.xlu0 %204 }
  0xaa   : > { %v206_v18 = vadd.f32 %v205_v17, %v193_v16 }
  0xab   : > { %v210_v25 = vld [vmem:[%s623_s1] sm:$0xf] (%p168_p0) }
  0xac   : > { %207 = vst.msk [vmem:[%s624_s2] sm:$0xf] %vm191_vm2, %v206_v18  ;;  %v220_v29 = vmul.f32 (%p168_p0), %v210_v25, %v210_v25  ;;  %v219_v35 = vmul.f32 (%p168_p0), %v218_v33, %v210_v25 }
  0xae   : > { %v221_v36 = vmul.f32 %v220_v29, %v218_v33  ;;  %v244_v38 = vsub.f32 0.0, %v219_v35 }
  0xb0   : > { %245 = vst.msk [vmem:[%s623_s1] sm:$0xf] %vm191_vm2, %v244_v38 }
  0xb3   : > { %v211_v34 = vld [vmem:[%s624_s2] sm:$0xf] }
  0xb4   : > { %v222_v39 = vsub.f32 %v211_v34, %v221_v36 }
  0xb6   : > { %v230_v40 = vmul.f32 %v229_v37, %v222_v39 }
  0xb8   : > { %v231_v41 = vmax.f32 %v230_v40, 0.0 }
  0xba   : > { %397 = vrsqrt.f32 %v231_v41  ;;  %vm239_vm5 = vcmp.eq.f32.partialorder %v231_v41, inf  ;;  %v242_v48 = vand.u32 2147483648, %v231_v41  ;;  %vm241_vm6 = vcmp.eq.f32.partialorder %v231_v41, 0.0 }
  0xc0   : > { %v398_v42 = vpop.eup %397 }
  0xc1   : > { %v233_v43 = vmul.f32 %v398_v42, %v231_v41 }
  0xc3   : > { %v234_v44 = vmul.f32 %v398_v42, %v233_v43 }
  0xc5   : > { %v235_v45 = vmul.f32 0.5, %v234_v44 }
  0xc7   : > { %v236_v46 = vsub.f32 1.5, %v235_v45 }
  0xc9   : > { %v237_v47 = vmul.f32 %v398_v42, %v236_v46 }
  0xcb   : > { %v238_v49 = vmul.f32 %v237_v47, %v231_v41 }
  0xcd   : > { %v240_v50 = vsel %vm239_vm5, %v231_v41, %v238_v49 }
  0xce   : > { %v243_v51 = vsel %vm241_vm6, %v242_v48, %v240_v50 }
  0xcf   : > { %v246_v52 = vadd.f32 1e-06, %v243_v51 }
  0xd1   : > { %399 = vrcp.f32 %v246_v52  ;;  %v258_v55 = vand.u32 2147483648, %v246_v52  ;;  %vm252_vm7 = vweird.f32 %v246_v52  ;;  %v256_v57 = vand.u32 2147483647, %v246_v52 }
  0xd3   : > { %v259_v59 = vor.u32 1.1754944e-38, %v258_v55  ;;  %vm257_vm10 = vcmp.eq.f32.partialorder %v256_v57, 8.507059e+37 }
  0xd7   : > { %v400_v53 = vpop.eup %399 }
  0xd8   : > { %v248_v54 = vmul.f32 %v400_v53, %v246_v52  ;;  %vm253_vm8 = vweird.f32 %v400_v53 }
  0xd9   : > { %vm254_vm9 = vmor %vm252_vm7, %vm253_vm8 }
  0xda   : > { %v249_v56 = vsub.f32 1.0, %v248_v54 }
  0xdc   : > { %v250_v58 = vmul.f32 %v400_v53, %v249_v56 }
  0xde   : > { %v251_v60 = vadd.f32 %v400_v53, %v250_v58 }
  0xe0   : > { %v255_v61 = vsel %vm254_vm9, %v400_v53, %v251_v60 }
  0xe1   : > { %v260_v62 = vsel %vm257_vm10, %v259_v59, %v255_v61 }
  0xe2   : > { %262 = vst.msk [vmem:[%s624_s2] sm:$0xf] %vm191_vm2, %v260_v62 }
  0xe3 PF: > { %s16_s14 = sadd.s32 1, %s481_s14   ;;  %s627_s9 = smov %s465_s10 }
  0xe4   : > { %p13_p1 = scmp.ge.s32.totalorder %s16_s14, 4   ;;  %s628_s10 = smov %s469_s11 }
  0xe5   : > { %s629_s11 = smov %s550_s21  ;;  %s630_s12 = smov %s477_s13 }
  0xe6   : > { %s631_s13 = smov %s633_s16  ;;  %15 = sbr.rel (!%p13_p1) target bundleno = 4 (0x4), region = 76 }
  0xeb   :  { %280 = vsyncpa [#allocation3], 1 }
  0xec   :  { %282 = vsyncpa [#allocation3 + $0x1], 1 }

</bundles_post_ra>
